<compile_context>
chip_gen: v6e
topology: v6e:2x2x1
jax: 0.10.0
libtpu: 0.0.40
codegen_flags: <defaults>
</compile_context>

<pallas_src>
import functools

import jax
import jax.numpy as jnp
from jax import lax
from jax.experimental import pallas as pl
from jax.experimental.pallas import tpu as pltpu

C1, K1 = 6, 5      # conv1: 1 -> 6, kernel 5
C2, K2 = 16, 5     # conv2: 6 -> 16, kernel 5
FC1_OUT = 128
FC2_OUT = 5
OUT_ROWS = 8       # FC2_OUT padded to a full sublane for unmasked stores


def _round_up(n, m):
    return ((n + m - 1) // m) * m


def mycnn_kernel(w1_ref, b1_ref, w2_ref, b2_ref,
                 fc1w_ref, fc1b_ref, fc2w_ref, fc2b_ref,
                 x_ref, out_ref, *, r1, f):
    """One batch tile: 4 MXU matmuls + f32 elementwise max/bias/ReLU."""
    cdt = w1_ref.dtype                                               # compute dtype
    x = x_ref[...]                                                   # (L_pad, TB)

    # conv1 + maxpool(2,2) + ReLU: one banded matmul holding both pooling
    # candidates (even rows [0:r1), odd rows [r1:2*r1)), then elementwise max.
    z1 = jnp.dot(w1_ref[...], x, preferred_element_type=jnp.float32)  # (2*r1, TB)
    p1 = jnp.maximum(jnp.maximum(z1[:r1], z1[r1:]) + b1_ref[...], 0.0)

    # conv2 + maxpool(2,2) + ReLU: rows already in torch flatten order (c*P2 + j).
    z2 = jnp.dot(w2_ref[...], p1.astype(cdt),
                 preferred_element_type=jnp.float32)                  # (2*f, TB)
    flat = jnp.maximum(jnp.maximum(z2[:f], z2[f:]) + b2_ref[...], 0.0)

    # fc1 + ReLU, fc2 -- plain MXU matmuls in (features, batch) orientation.
    h = jnp.maximum(
        jnp.dot(fc1w_ref[...], flat.astype(cdt),
                preferred_element_type=jnp.float32) + fc1b_ref[...], 0.0)
    out_ref[...] = (jnp.dot(fc2w_ref[...], h.astype(cdt),
                            preferred_element_type=jnp.float32) + fc2b_ref[...])


def _banded_conv_pool_weights(w, p_out, n_rows, n_cols, chan_stride, offset):
    """Expand conv weights (C_out, C_in, K) into a banded matrix B (n_rows, n_cols):
        (B @ act)[c_out * p_out + j] =
            sum_{c_in,k} w[c_out,c_in,k] * act[c_in*chan_stride + 2*j + offset + k]
    i.e. one max-pool(2,2) candidate (offset=0 even / offset=1 odd) of the conv."""
    c_out, c_in, k = w.shape
    co = jnp.arange(c_out).reshape(c_out, 1, 1, 1)
    ci = jnp.arange(c_in).reshape(1, c_in, 1, 1)
    jj = jnp.arange(p_out).reshape(1, 1, p_out, 1)
    kk = jnp.arange(k).reshape(1, 1, 1, k)
    shp = (c_out, c_in, p_out, k)
    rows = jnp.broadcast_to(co * p_out + jj, shp).ravel()
    cols = jnp.broadcast_to(ci * chan_stride + 2 * jj + offset + kk, shp).ravel()
    vals = jnp.broadcast_to(w[:, :, None, :], shp).ravel().astype(jnp.float32)
    return jnp.zeros((n_rows, n_cols), jnp.float32).at[rows, cols].set(vals)


@functools.partial(jax.jit, static_argnums=(2, 3))
def mycnn_forward(x, params, tb=512, compute_dtype=jnp.bfloat16):
    """x: (B, 1, seq_len) float32, like the PyTorch module.  Returns (B, 5) float32.

    tb is the batch (lane) tile width, multiple of 128.  512-2048 is the sweet spot
    for large batches (per-grid-step overhead dominates at 128); it is automatically
    capped so that the grid has >=2 steps when B allows it (v7x dual-TC)."""
    w1, b1, w2, b2, fc1w, fc1b, fc2w, fc2b = params
    B, cin, L = x.shape
    assert cin == 1
    P1 = (L - (K1 - 1)) // 2
    P2 = (P1 - (K2 - 1)) // 2
    assert P2 >= 1, "seq_len too short for this architecture"
    F = C2 * P2                            # torch flatten width (multiple of 16)
    assert fc1w.shape == (FC1_OUT, F)

    R1 = _round_up(C1 * P1, 8)             # sublane-aligned even/odd split point
    L_pad = _round_up(L, 8)                # clean sublane tiling for matmul K dim

    # Fused banded ("weight-side im2col") matrices: rows [0:R) = even pooling
    # candidate, rows [R:2R) = odd candidate, so conv+pool == one matmul + max.
    w1cat = jnp.concatenate(
        [_banded_conv_pool_weights(w1, P1, R1, L_pad, L_pad, 0),
         _banded_conv_pool_weights(w1, P1, R1, L_pad, L_pad, 1)], axis=0)
    w2cat = jnp.concatenate(
        [_banded_conv_pool_weights(w2, P2, F, R1, P1, 0),
         _banded_conv_pool_weights(w2, P2, F, R1, P1, 1)], axis=0)
    b1x = jnp.zeros((R1, 1), jnp.float32).at[:C1 * P1, 0].set(
        jnp.repeat(b1.astype(jnp.float32), P1))
    b2x = jnp.repeat(b2.astype(jnp.float32), P2).reshape(F, 1)
    fc2w_p = jnp.zeros((OUT_ROWS, FC1_OUT), jnp.float32).at[:FC2_OUT].set(
        fc2w.astype(jnp.float32))
    fc2b_p = jnp.zeros((OUT_ROWS, 1), jnp.float32).at[:FC2_OUT, 0].set(
        fc2b.astype(jnp.float32))

    # Batch tile selection: large by default, but ensure >=2 grid steps when B
    # allows it (keeps both v7x TensorCores busy); never below 128.
    tb_eff = max(128, min(int(tb), _round_up(-(-B // 2), 128)))
    nb = pl.cdiv(B, tb_eff)
    b_pad = nb * tb_eff

    # Batch onto the 128-wide lane axis; pad batch/sequence with zeros (padded
    # rows/columns never reach the sliced output).
    x2 = jnp.pad(x[:, 0, :].astype(compute_dtype),
                 ((0, b_pad - B), (0, L_pad - L)))                   # (b_pad, L_pad)
    x_k = x2.T                                                       # (L_pad, b_pad)

    # MXU operands in compute_dtype (bf16 by default: native on v5e/v6e/v7x MXU,
    # halves x/weight DMA bytes); biases stay f32 so VPU elementwise is f32.
    w_args = (w1cat.astype(compute_dtype), b1x,
              w2cat.astype(compute_dtype), b2x,
              fc1w.astype(compute_dtype),
              fc1b.astype(jnp.float32).reshape(FC1_OUT, 1),
              fc2w_p.astype(compute_dtype), fc2b_p)

    def full(a):
        return pl.BlockSpec(a.shape, lambda i: (0,) * a.ndim)

    out = pl.pallas_call(
        functools.partial(mycnn_kernel, r1=R1, f=F),
        out_shape=jax.ShapeDtypeStruct((OUT_ROWS, b_pad), jnp.float32),
        grid=(nb,),
        in_specs=[full(a) for a in w_args]
                 + [pl.BlockSpec((L_pad, tb_eff), lambda i: (0, i))],
        out_specs=pl.BlockSpec((OUT_ROWS, tb_eff), lambda i: (0, i)),
        compiler_params=pltpu.CompilerParams(
            dimension_semantics=("parallel",)),   # shards batch tiles over TCs on v7x
    )(*w_args, x_k)
    return out[:FC2_OUT, :B].T                                       # (B, 5)


def ref_forward(x, params):
    """Pure-JAX reference of the PyTorch forward (numerical self-check)."""
    w1, b1, w2, b2, fc1w, fc1b, fc2w, fc2b = params
    dn = ("NCH", "OIH", "NCH")
    hi = lax.Precision.HIGHEST
    y = lax.conv_general_dilated(x, w1, (1,), "VALID",
                                 dimension_numbers=dn, precision=hi)
    y = jnp.maximum(y + b1[None, :, None], 0.0)
    B, C, Ln = y.shape
    y = y[:, :, :(Ln // 2) * 2].reshape(B, C, Ln // 2, 2).max(-1)
    y = lax.conv_general_dilated(y, w2, (1,), "VALID",
                                 dimension_numbers=dn, precision=hi)
    y = jnp.maximum(y + b2[None, :, None], 0.0)
    B, C, Ln = y.shape
    y = y[:, :, :(Ln // 2) * 2].reshape(B, C, Ln // 2, 2).max(-1)
    flat = y.reshape(B, -1)
    h = jnp.maximum(jnp.dot(flat, fc1w.T, precision=hi) + fc1b, 0.0)
    return jnp.dot(h, fc2w.T, precision=hi) + fc2b


if __name__ == "__main__":
    B = 4
    SEQ_LEN = 28                       # -> P2 = 4, fc1 in_features = 16*4 = 64
    F = C2 * (((SEQ_LEN - 4) // 2 - 4) // 2)

    key = jax.random.PRNGKey(0)
    ks = jax.random.split(key, 9)

    def uinit(k, shape, fan_in):
        bound = float(fan_in) ** -0.5
        return jax.random.uniform(k, shape, jnp.float32, -bound, bound)

    params = (
        uinit(ks[0], (C1, 1, K1), K1),              # conv1.weight
        uinit(ks[1], (C1,), K1),                    # conv1.bias
        uinit(ks[2], (C2, C1, K2), C1 * K2),        # conv2.weight
        uinit(ks[3], (C2,), C1 * K2),               # conv2.bias
        uinit(ks[4], (FC1_OUT, F), F),              # fc1.weight
        uinit(ks[5], (FC1_OUT,), F),                # fc1.bias
        uinit(ks[6], (FC2_OUT, FC1_OUT), FC1_OUT),  # fc2.weight
        uinit(ks[7], (FC2_OUT,), FC1_OUT),          # fc2.bias
    )
    x = jax.random.normal(ks[8], (B, 1, SEQ_LEN), jnp.float32)

    ref = jax.block_until_ready(ref_forward(x, params))

    # f32-operand path: only MXU default-precision rounding vs the HIGHEST-precision ref.
    out_f32 = jax.block_until_ready(mycnn_forward(x, params, 512, jnp.float32))
    assert out_f32.shape == (B, FC2_OUT)
    assert bool(jnp.allclose(out_f32, ref, rtol=2e-2, atol=2e-2)), "f32 kernel/ref mismatch"

    # Default bf16-operand path (native MXU dtype on v6e/v7x); looser tolerance
    # covers bf16 operand/activation quantization across the 4 matmul stages.
    out_bf16 = jax.block_until_ready(mycnn_forward(x, params))
    assert out_bf16.shape == (B, FC2_OUT)
    assert bool(jnp.allclose(out_bf16, ref, rtol=1e-1, atol=1e-1)), "bf16 kernel/ref mismatch"

    print("KERNEL_OK")
</pallas_src>

<mosaic_0001>
module attributes {stable_mosaic.version = 11 : i64} {
  func.func @mycnn_kernel(%arg0: i32, %arg1: memref<144x32xf32, #tpu.memory_space<vmem>>, %arg2: memref<72x1xf32, #tpu.memory_space<vmem>>, %arg3: memref<128x72xf32, #tpu.memory_space<vmem>>, %arg4: memref<64x1xf32, #tpu.memory_space<vmem>>, %arg5: memref<128x64xf32, #tpu.memory_space<vmem>>, %arg6: memref<128x1xf32, #tpu.memory_space<vmem>>, %arg7: memref<8x128xf32, #tpu.memory_space<vmem>>, %arg8: memref<8x1xf32, #tpu.memory_space<vmem>>, %arg9: memref<32x128xf32, #tpu.memory_space<vmem>>, %arg10: memref<8x128xf32, #tpu.memory_space<vmem>>) attributes {dimension_semantics = [#tpu.dimension_semantics<parallel>], iteration_bounds = array<i64: 1>, scalar_prefetch = 0 : i64, scratch_operands = 0 : i64, tpu.core_type = #tpu.core_type<tc>, window_params = [{pipeline_mode = #tpu.pipeline_mode<synchronous>, transform_indices = @transform_0, window_bounds = array<i64: 144, 32>}, {pipeline_mode = #tpu.pipeline_mode<synchronous>, transform_indices = @transform_1, window_bounds = array<i64: 72, 1>}, {pipeline_mode = #tpu.pipeline_mode<synchronous>, transform_indices = @transform_2, window_bounds = array<i64: 128, 72>}, {pipeline_mode = #tpu.pipeline_mode<synchronous>, transform_indices = @transform_3, window_bounds = array<i64: 64, 1>}, {pipeline_mode = #tpu.pipeline_mode<synchronous>, transform_indices = @transform_4, window_bounds = array<i64: 128, 64>}, {pipeline_mode = #tpu.pipeline_mode<synchronous>, transform_indices = @transform_5, window_bounds = array<i64: 128, 1>}, {pipeline_mode = #tpu.pipeline_mode<synchronous>, transform_indices = @transform_6, window_bounds = array<i64: 8, 128>}, {pipeline_mode = #tpu.pipeline_mode<synchronous>, transform_indices = @transform_7, window_bounds = array<i64: 8, 1>}, {transform_indices = @transform_8, window_bounds = array<i64: 32, 128>}, {transform_indices = @transform_9, window_bounds = array<i64: 8, 128>}]} {
    %c0 = arith.constant 0 : index
    %c0_0 = arith.constant 0 : index
    %0 = vector.load %arg9[%c0, %c0_0] : memref<32x128xf32, #tpu.memory_space<vmem>>, vector<32x128xf32>
    %c0_1 = arith.constant 0 : index
    %c0_2 = arith.constant 0 : index
    %1 = vector.load %arg1[%c0_1, %c0_2] : memref<144x32xf32, #tpu.memory_space<vmem>>, vector<144x32xf32>
    %cst = arith.constant dense<0.000000e+00> : vector<144x128xf32>
    %2 = tpu.matmul %1, %0, %cst {dimension_numbers = #tpu.dot_dimension_numbers<[1], [0], [0], [1], [0, 0, 1, 1], [], []>} : vector<144x32xf32>, vector<32x128xf32>, vector<144x128xf32> -> vector<144x128xf32>
    %3 = vector.extract_strided_slice %2 {offsets = [0, 0], sizes = [72, 128], strides = [1, 1]} : vector<144x128xf32> to vector<72x128xf32>
    %4 = vector.extract_strided_slice %2 {offsets = [72, 0], sizes = [72, 128], strides = [1, 1]} : vector<144x128xf32> to vector<72x128xf32>
    %5 = arith.maximumf %3, %4 : vector<72x128xf32>
    %c0_3 = arith.constant 0 : index
    %c0_4 = arith.constant 0 : index
    %6 = vector.load %arg2[%c0_3, %c0_4] : memref<72x1xf32, #tpu.memory_space<vmem>>, vector<72x1xf32>
    %7 = vector.broadcast %6 : vector<72x1xf32> to vector<72x128xf32>
    %8 = arith.addf %5, %7 : vector<72x128xf32>
    %cst_5 = arith.constant 0.000000e+00 : f32
    %9 = vector.broadcast %cst_5 : f32 to vector<72x128xf32>
    %10 = arith.maximumf %8, %9 : vector<72x128xf32>
    %c0_6 = arith.constant 0 : index
    %c0_7 = arith.constant 0 : index
    %11 = vector.load %arg3[%c0_6, %c0_7] : memref<128x72xf32, #tpu.memory_space<vmem>>, vector<128x72xf32>
    %cst_8 = arith.constant dense<0.000000e+00> : vector<128x128xf32>
    %12 = tpu.matmul %11, %10, %cst_8 {dimension_numbers = #tpu.dot_dimension_numbers<[1], [0], [0], [1], [0, 0, 1, 1], [], []>} : vector<128x72xf32>, vector<72x128xf32>, vector<128x128xf32> -> vector<128x128xf32>
    %13 = vector.extract_strided_slice %12 {offsets = [0, 0], sizes = [64, 128], strides = [1, 1]} : vector<128x128xf32> to vector<64x128xf32>
    %14 = vector.extract_strided_slice %12 {offsets = [64, 0], sizes = [64, 128], strides = [1, 1]} : vector<128x128xf32> to vector<64x128xf32>
    %15 = arith.maximumf %13, %14 : vector<64x128xf32>
    %c0_9 = arith.constant 0 : index
    %c0_10 = arith.constant 0 : index
    %16 = vector.load %arg4[%c0_9, %c0_10] : memref<64x1xf32, #tpu.memory_space<vmem>>, vector<64x1xf32>
    %17 = vector.broadcast %16 : vector<64x1xf32> to vector<64x128xf32>
    %18 = arith.addf %15, %17 : vector<64x128xf32>
    %cst_11 = arith.constant 0.000000e+00 : f32
    %19 = vector.broadcast %cst_11 : f32 to vector<64x128xf32>
    %20 = arith.maximumf %18, %19 : vector<64x128xf32>
    %c0_12 = arith.constant 0 : index
    %c0_13 = arith.constant 0 : index
    %21 = vector.load %arg5[%c0_12, %c0_13] : memref<128x64xf32, #tpu.memory_space<vmem>>, vector<128x64xf32>
    %cst_14 = arith.constant dense<0.000000e+00> : vector<128x128xf32>
    %22 = tpu.matmul %21, %20, %cst_14 {dimension_numbers = #tpu.dot_dimension_numbers<[1], [0], [0], [1], [0, 0, 1, 1], [], []>} : vector<128x64xf32>, vector<64x128xf32>, vector<128x128xf32> -> vector<128x128xf32>
    %c0_15 = arith.constant 0 : index
    %c0_16 = arith.constant 0 : index
    %23 = vector.load %arg6[%c0_15, %c0_16] : memref<128x1xf32, #tpu.memory_space<vmem>>, vector<128x1xf32>
    %24 = vector.broadcast %23 : vector<128x1xf32> to vector<128x128xf32>
    %25 = arith.addf %22, %24 : vector<128x128xf32>
    %cst_17 = arith.constant 0.000000e+00 : f32
    %26 = vector.broadcast %cst_17 : f32 to vector<128x128xf32>
    %27 = arith.maximumf %25, %26 : vector<128x128xf32>
    %c0_18 = arith.constant 0 : index
    %c0_19 = arith.constant 0 : index
    %28 = vector.load %arg7[%c0_18, %c0_19] : memref<8x128xf32, #tpu.memory_space<vmem>>, vector<8x128xf32>
    %cst_20 = arith.constant dense<0.000000e+00> : vector<8x128xf32>
    %29 = tpu.matmul %28, %27, %cst_20 {dimension_numbers = #tpu.dot_dimension_numbers<[1], [0], [0], [1], [0, 0, 1, 1], [], []>} : vector<8x128xf32>, vector<128x128xf32>, vector<8x128xf32> -> vector<8x128xf32>
    %c0_21 = arith.constant 0 : index
    %c0_22 = arith.constant 0 : index
    %30 = vector.load %arg8[%c0_21, %c0_22] : memref<8x1xf32, #tpu.memory_space<vmem>>, vector<8x1xf32>
    %31 = vector.broadcast %30 : vector<8x1xf32> to vector<8x128xf32>
    %32 = arith.addf %29, %31 : vector<8x128xf32>
    %c0_23 = arith.constant 0 : index
    %c0_24 = arith.constant 0 : index
    %33 = vector.load %arg10[%c0_23, %c0_24] : memref<8x128xf32, #tpu.memory_space<vmem>>, vector<8x128xf32>
    tpu.vector_store %arg10[%c0_23, %c0_24], %32 {strides = array<i32>} : memref<8x128xf32, #tpu.memory_space<vmem>>, vector<8x128xf32>,
    return
  }
  func.func @transform_0(%arg0: i32) -> (i32, i32) {
    %c0_i32 = arith.constant 0 : i32
    %c0_i32_0 = arith.constant 0 : i32
    %c0_i32_1 = arith.constant 0 : i32
    return %c0_i32, %c0_i32_0 : i32, i32
  }
  func.func @transform_1(%arg0: i32) -> (i32, i32) {
    %c0_i32 = arith.constant 0 : i32
    %c0_i32_0 = arith.constant 0 : i32
    %c0_i32_1 = arith.constant 0 : i32
    return %c0_i32, %c0_i32_0 : i32, i32
  }
  func.func @transform_2(%arg0: i32) -> (i32, i32) {
    %c0_i32 = arith.constant 0 : i32
    %c0_i32_0 = arith.constant 0 : i32
    %c0_i32_1 = arith.constant 0 : i32
    return %c0_i32, %c0_i32_0 : i32, i32
  }
  func.func @transform_3(%arg0: i32) -> (i32, i32) {
    %c0_i32 = arith.constant 0 : i32
    %c0_i32_0 = arith.constant 0 : i32
    %c0_i32_1 = arith.constant 0 : i32
    return %c0_i32, %c0_i32_0 : i32, i32
  }
  func.func @transform_4(%arg0: i32) -> (i32, i32) {
    %c0_i32 = arith.constant 0 : i32
    %c0_i32_0 = arith.constant 0 : i32
    %c0_i32_1 = arith.constant 0 : i32
    return %c0_i32, %c0_i32_0 : i32, i32
  }
  func.func @transform_5(%arg0: i32) -> (i32, i32) {
    %c0_i32 = arith.constant 0 : i32
    %c0_i32_0 = arith.constant 0 : i32
    %c0_i32_1 = arith.constant 0 : i32
    return %c0_i32, %c0_i32_0 : i32, i32
  }
  func.func @transform_6(%arg0: i32) -> (i32, i32) {
    %c0_i32 = arith.constant 0 : i32
    %c0_i32_0 = arith.constant 0 : i32
    %c0_i32_1 = arith.constant 0 : i32
    return %c0_i32, %c0_i32_0 : i32, i32
  }
  func.func @transform_7(%arg0: i32) -> (i32, i32) {
    %c0_i32 = arith.constant 0 : i32
    %c0_i32_0 = arith.constant 0 : i32
    %c0_i32_1 = arith.constant 0 : i32
    return %c0_i32, %c0_i32_0 : i32, i32
  }
  func.func @transform_8(%arg0: i32) -> (i32, i32) {
    %c0_i32 = arith.constant 0 : i32
    %c0_i32_0 = arith.constant 0 : i32
    return %c0_i32, %arg0 : i32, i32
  }
  func.func @transform_9(%arg0: i32) -> (i32, i32) {
    %c0_i32 = arith.constant 0 : i32
    %c0_i32_0 = arith.constant 0 : i32
    return %c0_i32, %arg0 : i32, i32
  }
}

</mosaic_0001>

<bundles_post_ra>
// kernel: mycnn_forward.1
= control target key start
LH: loop header
LB: loop body
LE: loop exit
PB: predicated region body
PF: predicated region fallthrough
CT: control target
= control target key end

     0   :  { %v1334_v2 = vmov 0   ;;  %vm54_vm0 = vcmask 261120   ;;  %vm361_vm1 = vcmask 588800   ;;  %vm739_vm2 = vcmask 523264   ;;  %s1736_s8 = inlined_call_operand.vmem [shape: f32[32,128], index: 8, kind: input, shape index: {}]   ;;  %s1737_s0 = inlined_call_operand.vmem [shape: f32[144,32], index: 0, kind: input, shape index: {}]   ;;  %s1738_s1 = inlined_call_operand.vmem [shape: f32[72,1], index: 1, kind: input, shape index: {}]   ;;  %s1739_s3 = inlined_call_operand.vmem [shape: f32[64,1], index: 3, kind: input, shape index: {}]   ;;  %s1740_s5 = inlined_call_operand.vmem [shape: f32[128,1], index: 5, kind: input, shape index: {}]   ;;  %s1741_s7 = inlined_call_operand.vmem [shape: f32[8,1], index: 7, kind: input, shape index: {}]   ;;  %s1742_s2 = inlined_call_operand.vmem [shape: f32[128,72], index: 2, kind: input, shape index: {}]   ;;  %s1743_s4 = inlined_call_operand.vmem [shape: f32[128,64], index: 4, kind: input, shape index: {}]   ;;  %s1744_s6 = inlined_call_operand.vmem [shape: f32[8,128], index: 6, kind: input, shape index: {}]   ;;  %s1745_s9 = inlined_call_operand.vmem [shape: f32[8,128], index: 9, kind: output, shape index: {}]  }
   0x1   :  { %v35_v0 = vld [vmem:[%s1736_s8 + $0x18] sm:$0xff]  ;;  %v34_v1 = vld [vmem:[%s1736_s8 + $0x10] sm:$0xff]  ;;  %1332 = vset.pattern.permute.xlu0 %v1334_v2  ;;  %1333 = vset.pattern.permute.xlu1 %v1334_v2  ;;  %v33_v3 = vld [vmem:[%s1736_s8 + $0x8] sm:$0xff]  ;;  %vm1336_vm3 = vmmov 0  }
   0x2   :  { %1169 = vmatprep.subr.mxu0 %v35_v0  ;;  %1321 = vmatprep.subr.mxu1 %v35_v0  ;;  %v32_v4 = vld [vmem:[%s1736_s8] sm:$0xff]  ;;  %v37_v7 = vld [vmem:[%s1737_s0 + $0x8] sm:$0xff]  ;;  %v38_v9 = vld [vmem:[%s1737_s0 + $0x10] sm:$0xff] }
   0x3   :  { %1170 = vmatpush3.msra.mxu0 %v35_v0  ;;  %1325 = vmatpush3.msra.mxu1 %v35_v0  ;;  %v36_v5 = vld [vmem:[%s1737_s0] sm:$0xff]  ;;  %v45_v8 = vld [vmem:[%s1737_s0 + $0x48] sm:$0xff]  ;;  %v46_v10 = vld [vmem:[%s1737_s0 + $0x50] sm:$0xff] }
   0x4   :  { %1171 = vmatprep.subr.mxu0 %v34_v1  ;;  %1322 = vmatprep.subr.mxu1 %v34_v1  ;;  %v44_v6 = vld [vmem:[%s1737_s0 + $0x40] sm:$0xff]  ;;  %v279_v12 = vld [vmem:[%s1738_s1 + $0x30] sm:$0xff]  ;;  %v39_v13 = vld [vmem:[%s1737_s0 + $0x18] sm:$0xff] }
   0x5   :  { %1172 = vmatpush3.msra.mxu0 %v34_v1  ;;  %1326 = vmatpush3.msra.mxu1 %v34_v1  ;;  %v281_v11 = vld [vmem:[%s1738_s1 + $0x40] sm:$0xff]  ;;  %v47_v14 = vld [vmem:[%s1737_s0 + $0x58] sm:$0xff]  ;;  %v278_v18 = vld [vmem:[%s1738_s1 + $0x28] sm:$0xff] }
   0x6   :  { %1173 = vmatprep.subr.mxu0 %v33_v3  ;;  %1323 = vmatprep.subr.mxu1 %v33_v3  ;;  %v40_v15 = vld [vmem:[%s1737_s0 + $0x20] sm:$0xff]  ;;  %v280_v17 = vld [vmem:[%s1738_s1 + $0x38] sm:$0xff]  ;;  %v41_v19 = vld [vmem:[%s1737_s0 + $0x28] sm:$0xff] }
   0x7   :  { %1174 = vmatpush3.msra.mxu0 %v33_v3  ;;  %1327 = vmatpush3.msra.mxu1 %v33_v3  ;;  %v48_v16 = vld [vmem:[%s1737_s0 + $0x60] sm:$0xff]  ;;  %v49_v20 = vld [vmem:[%s1737_s0 + $0x68] sm:$0xff]  ;;  %v42_v21 = vld [vmem:[%s1737_s0 + $0x30] sm:$0xff] }
   0x8   :  { %1175 = vmatprep.subr.mxu0 %v32_v4  ;;  %1324 = vmatprep.subr.mxu1 %v32_v4  ;;  %v50_v22 = vld [vmem:[%s1737_s0 + $0x70] sm:$0xff]  ;;  %v277_v23 = vld [vmem:[%s1738_s1 + $0x20] sm:$0xff]  ;;  %v276_v24 = vld [vmem:[%s1738_s1 + $0x18] sm:$0xff] }
   0x9   :  { %1176 = vmatpush3.msra.mxu0 %v32_v4  ;;  %1328 = vmatpush3.msra.mxu1 %v32_v4  ;;  %v43_v25 = vld [vmem:[%s1737_s0 + $0x38] sm:$0xff]  ;;  %v52_v27 = vld [vmem:[%s1737_s0 + $0x80] sm:$0xff]  ;;  %v275_v28 = vld [vmem:[%s1738_s1 + $0x10] sm:$0xff] }
   0xa   :  { %1177 = vmatprep.mubr.msk.f32.mxu0 %vm54_vm0, %v36_v5  ;;  %1189 = vmatprep.mubr.msk.f32.mxu1 %vm54_vm0, %v44_v6  ;;  %v51_v26 = vld [vmem:[%s1737_s0 + $0x78] sm:$0xff]  ;;  %v274_v29 = vld [vmem:[%s1738_s1 + $0x8] sm:$0xff]  ;;  %v273_v31 = vld [vmem:[%s1738_s1] sm:$0xff] }
   0xb   :  { %1178 = vmatmul.mubr.msk.f32.vlgmr.msra.gmra.mxu0 %vm54_vm0, %v37_v7  ;;  %1190 = vmatmul.mubr.msk.f32.vlgmr.msra.gmra.mxu1 %vm54_vm0, %v45_v8  ;;  %v53_v30 = vld [vmem:[%s1737_s0 + $0x88] sm:$0xff]  ;;  %v570_v32 = vld [vmem:[%s1739_s3 + $0x38] sm:$0xff]  ;;  %v569_v33 = vld [vmem:[%s1739_s3 + $0x30] sm:$0xff] }
   0xc   :  { %1180 = vmatprep.mubr.msk.f32.mxu0 %vm54_vm0, %v38_v9  ;;  %1192 = vmatprep.mubr.msk.f32.mxu1 %vm54_vm0, %v46_v10  ;;  %v568_v34 = vld [vmem:[%s1739_s3 + $0x28] sm:$0xff]  ;;  %v567_v35 = vld [vmem:[%s1739_s3 + $0x20] sm:$0xff]  ;;  %v566_v36 = vld [vmem:[%s1739_s3 + $0x18] sm:$0xff] }
   0xd   :  { %324 = vperm.xlu0 %1332, %v281_v11   ;;  %314 = vperm.xlu1 %1333, %v279_v12   ;;  %v565_v37 = vld [vmem:[%s1739_s3 + $0x10] sm:$0xff]  ;;  %v564_v38 = vld [vmem:[%s1739_s3 + $0x8] sm:$0xff]  ;;  %v563_v39 = vld [vmem:[%s1739_s3] sm:$0xff] }
   0xe   :  { %v658_v40 = vld [vmem:[%s1740_s5 + $0x78] sm:$0xff]  ;;  %v657_v41 = vld [vmem:[%s1740_s5 + $0x70] sm:$0xff]  ;;  %v656_v42 = vld [vmem:[%s1740_s5 + $0x68] sm:$0xff] }
   0xf   :  { %1181 = vmatmul.mubr.msk.f32.gmra.mxu0 %vm54_vm0, %v39_v13  ;;  %1193 = vmatmul.mubr.msk.f32.gmra.mxu1 %vm54_vm0, %v47_v14  ;;  %v655_v43 = vld [vmem:[%s1740_s5 + $0x60] sm:$0xff]  ;;  %v654_v44 = vld [vmem:[%s1740_s5 + $0x58] sm:$0xff]  ;;  %v653_v45 = vld [vmem:[%s1740_s5 + $0x50] sm:$0xff] }
  0x10   :  { %1183 = vmatprep.mubr.msk.f32.mxu0 %vm54_vm0, %v40_v15  ;;  %1195 = vmatprep.mubr.msk.f32.mxu1 %vm54_vm0, %v48_v16  ;;  %v652_v46 = vld [vmem:[%s1740_s5 + $0x48] sm:$0xff]  ;;  %v651_v47 = vld [vmem:[%s1740_s5 + $0x40] sm:$0xff]  ;;  %v650_v48 = vld [vmem:[%s1740_s5 + $0x38] sm:$0xff] }
  0x11   :  { %319 = vperm.xlu0 %1332, %v280_v17   ;;  %309 = vperm.xlu1 %1333, %v278_v18   ;;  %v649_v49 = vld [vmem:[%s1740_s5 + $0x30] sm:$0xff]  ;;  %v648_v50 = vld [vmem:[%s1740_s5 + $0x28] sm:$0xff]  ;;  %v647_v51 = vld [vmem:[%s1740_s5 + $0x20] sm:$0xff] }
  0x12   :  { %v646_v52 = vld [vmem:[%s1740_s5 + $0x18] sm:$0xff]  ;;  %v645_v53 = vld [vmem:[%s1740_s5 + $0x10] sm:$0xff]  ;;  %v644_v54 = vld [vmem:[%s1740_s5 + $0x8] sm:$0xff] }
  0x13   :  { %1184 = vmatmul.mubr.msk.f32.gmra.mxu0 %vm54_vm0, %v41_v19  ;;  %1196 = vmatmul.mubr.msk.f32.gmra.mxu1 %vm54_vm0, %v49_v20  ;;  %v643_v55 = vld [vmem:[%s1740_s5] sm:$0xff] }
  0x14   :  { %1186 = vmatprep.mubr.msk.f32.mxu0 %vm54_vm0, %v42_v21  ;;  %1198 = vmatprep.mubr.msk.f32.mxu1 %vm54_vm0, %v50_v22  ;;  %v950_v56 = vld [vmem:[%s1741_s7] sm:$0xff] }
  0x15   :  { %304 = vperm.xlu0 %1332, %v277_v23   ;;  %299 = vperm.xlu1 %1333, %v276_v24   ;;  %v345_v57 = vld [vmem:[%s1742_s2] sm:$0xff] }
  0x17   :  { %1187 = vmatmul.mubr.msk.f32.gmra.mxu0 %vm54_vm0, %v43_v25  ;;  %1199 = vmatmul.mubr.msk.f32.gmra.mxu1 %vm54_vm0, %v51_v26 }
  0x18   :  { %1201 = vmatprep.mubr.msk.f32.mxu1 %vm54_vm0, %v52_v27 }
  0x19   :  { %294 = vperm.xlu0 %1332, %v275_v28   ;;  %289 = vperm.xlu1 %1333, %v274_v29  }
  0x1b   :  { %1202 = vmatmul.mubr.msk.f32.gmra.mxu1 %vm54_vm0, %v53_v30 }
  0x1c   :  { %1222 = vmatprep.mubr.msk.f32.mxu1 %vm361_vm1, %v345_v57  ;;  %v355_v57 = vld [vmem:[%s1742_s2 + $0x50] sm:$0xff] }
  0x1d   :  { %284 = vperm.xlu0 %1332, %v273_v31   ;;  %608 = vperm.xlu1 %1333, %v570_v32  }
  0x21   :  { %603 = vperm.xlu0 %1332, %v569_v33   ;;  %598 = vperm.xlu1 %1333, %v568_v34  }
  0x25   :  { %593 = vperm.xlu0 %1332, %v567_v35   ;;  %588 = vperm.xlu1 %1333, %v566_v36  }
  0x29   :  { %583 = vperm.xlu0 %1332, %v565_v37   ;;  %578 = vperm.xlu1 %1333, %v564_v38  }
  0x2d   :  { %573 = vperm.xlu0 %1332, %v563_v39   ;;  %736 = vperm.xlu1 %1333, %v658_v40  }
  0x31   :  { %731 = vperm.xlu0 %1332, %v657_v41   ;;  %726 = vperm.xlu1 %1333, %v656_v42  }
  0x35   :  { %721 = vperm.xlu0 %1332, %v655_v43   ;;  %716 = vperm.xlu1 %1333, %v654_v44  }
  0x39   :  { %711 = vperm.xlu0 %1332, %v653_v45   ;;  %706 = vperm.xlu1 %1333, %v652_v46  }
  0x3d   :  { %701 = vperm.xlu0 %1332, %v651_v47   ;;  %696 = vperm.xlu1 %1333, %v650_v48   ;;  %v346_v48 = vld [vmem:[%s1742_s2 + $0x8] sm:$0xff] }
  0x41   :  { %691 = vperm.xlu0 %1332, %v649_v49   ;;  %686 = vperm.xlu1 %1333, %v648_v50   ;;  %v347_v49 = vld [vmem:[%s1742_s2 + $0x10] sm:$0xff]  ;;  %v348_v50 = vld [vmem:[%s1742_s2 + $0x18] sm:$0xff] }
  0x45   :  { %681 = vperm.xlu0 %1332, %v647_v51   ;;  %676 = vperm.xlu1 %1333, %v646_v52   ;;  %v349_v51 = vld [vmem:[%s1742_s2 + $0x20] sm:$0xff]  ;;  %v350_v52 = vld [vmem:[%s1742_s2 + $0x28] sm:$0xff] }
  0x49   :  { %671 = vperm.xlu0 %1332, %v645_v53   ;;  %666 = vperm.xlu1 %1333, %v644_v54   ;;  %v351_v53 = vld [vmem:[%s1742_s2 + $0x30] sm:$0xff]  ;;  %v352_v54 = vld [vmem:[%s1742_s2 + $0x38] sm:$0xff] }
  0x4d   :  { %661 = vperm.xlu0 %1332, %v643_v55   ;;  %953 = vperm.xlu1 %1333, %v950_v56   ;;  %v353_v55 = vld [vmem:[%s1742_s2 + $0x40] sm:$0xff]  ;;  %v354_v56 = vld [vmem:[%s1742_s2 + $0x48] sm:$0xff] }
  0x88   :  { %v325_v2 = vpop.permute.xlu0 %324  ;;  %v315_v7 = vpop.permute.xlu1 %314 }
  0x8c   :  { %v320_v10 = vpop.permute.xlu0 %319  ;;  %v310_v16 = vpop.permute.xlu1 %309 }
  0x90   :  { %v305_v21 = vpop.permute.xlu0 %304  ;;  %v300_v29 = vpop.permute.xlu1 %299 }
  0x94   :  { %v295_v33 = vpop.permute.xlu0 %294  ;;  %v290_v40 = vpop.permute.xlu1 %289 }
  0x98   :  { %v285_v43 = vpop.permute.xlu0 %284 }
  0xcb   :  { %v1179_v58 = vpop.f32.mrf.mxu0  ;;  %v1191_v59 = vpop.f32.mrf.mxu1 }
  0xcd   :  { %v175_v60 = vpop.f32.mrf.mxu0  ;;  %v215_v61 = vpop.f32.mrf.mxu1 }
  0xce   :  { %v264_v37 = vmax.f32 %v175_v60, %v1191_v59  ;;  %v357_v59 = vld [vmem:[%s1742_s2 + $0x60] sm:$0xff]  ;;  %v358_v60 = vld [vmem:[%s1742_s2 + $0x68] sm:$0xff] }
  0xcf   :  { %v1182_v62 = vpop.f32.mrf.mxu0  ;;  %v1194_v63 = vpop.f32.mrf.mxu1 }
  0xd0   :  { %v327_v44 = vadd.f32 %v285_v43, %v264_v37 }
  0xd1   :  { %v185_v0 = vpop.f32.mrf.mxu0  ;;  %v225_v1 = vpop.f32.mrf.mxu1 }
  0xd2   :  { %v266_v30 = vmax.f32 %v185_v0, %v1194_v63  ;;  %v265_v34 = vmax.f32 %v1179_v58, %v225_v1  ;;  %v336_v47 = vmax.f32 %v327_v44, 0.0  ;;  %v356_v58 = vld [vmem:[%s1742_s2 + $0x58] sm:$0xff]  ;;  %v627_v63 = vld [vmem:[%s1743_s4] sm:$0xff] }
  0xd3   :  { %v1185_v3 = vpop.f32.mrf.mxu0  ;;  %v1197_v4 = vpop.f32.mrf.mxu1  ;;  %1262 = vmatprep.mubr.msk.f32.mxu0 %vm739_vm2, %v627_v63  ;;  %v1335_v63 = vmov 0.0  }
  0xd4   :  { %v329_v38 = vadd.f32 %v295_v33, %v266_v30  ;;  %v328_v41 = vadd.f32 %v290_v40, %v265_v34 }
  0xd5   :  { %v195_v5 = vpop.f32.mrf.mxu0  ;;  %v235_v6 = vpop.f32.mrf.mxu1 }
  0xd6   :  { %v268_v22 = vmax.f32 %v195_v5, %v1197_v4  ;;  %v267_v26 = vmax.f32 %v1182_v62, %v235_v6  ;;  %v338_v45 = vmax.f32 %v329_v38, 0.0  ;;  %v337_v46 = vmax.f32 %v328_v41, 0.0  ;;  %v360_v62 = vld [vmem:[%s1742_s2 + $0x78] sm:$0xff] }
  0xd7   :  { %v1188_v8 = vpop.f32.mrf.mxu0  ;;  %v1200_v9 = vpop.f32.mrf.mxu1 }
  0xd8   :  { %v331_v31 = vadd.f32 %v305_v21, %v268_v22  ;;  %v330_v35 = vadd.f32 %v300_v29, %v267_v26 }
  0xd9   :  { %v205_v11 = vpop.f32.mrf.mxu0  ;;  %v245_v12 = vpop.f32.mrf.mxu1 }
  0xda   :  { %v270_v14 = vmax.f32 %v205_v11, %v1200_v9  ;;  %v269_v18 = vmax.f32 %v1185_v3, %v245_v12  ;;  %v340_v39 = vmax.f32 %v331_v31, 0.0  ;;  %v339_v42 = vmax.f32 %v330_v35, 0.0  ;;  %v609_v11 = vpop.permute.xlu1 %608 }
  0xdb   :  { %v1203_v13 = vpop.f32.mrf.mxu1 }
  0xdc   :  { %v272_v15 = vmax.f32 %v215_v61, %v1203_v13  ;;  %v333_v23 = vadd.f32 %v315_v7, %v270_v14  ;;  %v332_v27 = vadd.f32 %v310_v16, %v269_v18  ;;  %v359_v61 = vld [vmem:[%s1742_s2 + $0x70] sm:$0xff]  ;;  %v604_v13 = vpop.permute.xlu0 %603 }
  0xdd   :  { %v255_v17 = vpop.f32.mrf.mxu1 }
  0xde   :  { %v335_v19 = vadd.f32 %v325_v2, %v272_v15  ;;  %v271_v20 = vmax.f32 %v1188_v8, %v255_v17  ;;  %v342_v32 = vmax.f32 %v333_v23, 0.0  ;;  %v341_v36 = vmax.f32 %v332_v27, 0.0  ;;  %v599_v16 = vpop.permute.xlu1 %598 }
  0xe0   :  { %v344_v24 = vmax.f32 %v335_v19, 0.0  ;;  %v334_v25 = vadd.f32 %v320_v10, %v271_v20  ;;  %v594_v20 = vpop.permute.xlu0 %593 }
  0xe2   :  { %v343_v28 = vmax.f32 %v334_v25, 0.0  ;;  %1204 = vmatprep.subr.mxu1 %v344_v24  ;;  %v589_v29 = vpop.permute.xlu1 %588 }
  0xe3   :  { %1205 = vmatpush3.msra.mxu1 %v344_v24 }
  0xe4   :  { %1206 = vmatprep.subr.mxu1 %v343_v28  ;;  %v584_v33 = vpop.permute.xlu0 %583 }
  0xe5   :  { %1207 = vmatpush3.msra.mxu1 %v343_v28 }
  0xe6   :  { %1208 = vmatprep.subr.mxu1 %v342_v32  ;;  %v579_v40 = vpop.permute.xlu1 %578 }
  0xe7   :  { %1209 = vmatpush3.msra.mxu1 %v342_v32 }
  0xe8   :  { %1210 = vmatprep.subr.mxu1 %v341_v36  ;;  %v574_v43 = vpop.permute.xlu0 %573 }
  0xe9   :  { %1211 = vmatpush3.msra.mxu1 %v341_v36 }
  0xea   :  { %1212 = vmatprep.subr.mxu1 %v340_v39 }
  0xeb   :  { %1213 = vmatpush3.msra.mxu1 %v340_v39 }
  0xec   :  { %1214 = vmatprep.subr.mxu1 %v339_v42 }
  0xed   :  { %1215 = vmatpush3.msra.mxu1 %v339_v42 }
  0xee   :  { %1216 = vmatprep.subr.mxu1 %v338_v45 }
  0xef   :  { %1217 = vmatpush3.msra.mxu1 %v338_v45 }
  0xf0   :  { %1218 = vmatprep.subr.mxu1 %v337_v46 }
  0xf1   :  { %1219 = vmatpush3.msra.mxu1 %v337_v46 }
  0xf2   :  { %1220 = vmatprep.subr.mxu1 %v336_v47 }
  0xf3   :  { %1221 = vmatpush3.msra.mxu1 %v336_v47 }
  0xf4   :  { %1223 = vmatmul.mubr.msk.f32.vlgmr.msra.gmra.mxu1 %vm361_vm1, %v346_v48  ;;  %v628_v48 = vld [vmem:[%s1743_s4 + $0x8] sm:$0xff] }
  0xf5   :  { %1225 = vmatprep.mubr.msk.f32.mxu1 %vm361_vm1, %v347_v49  ;;  %v629_v49 = vld [vmem:[%s1743_s4 + $0x10] sm:$0xff] }
  0xf8   :  { %1226 = vmatmul.mubr.msk.f32.gmra.mxu1 %vm361_vm1, %v348_v50  ;;  %v630_v50 = vld [vmem:[%s1743_s4 + $0x18] sm:$0xff] }
  0xf9   :  { %1228 = vmatprep.mubr.msk.f32.mxu1 %vm361_vm1, %v349_v51  ;;  %v631_v51 = vld [vmem:[%s1743_s4 + $0x20] sm:$0xff] }
  0xfc   :  { %1229 = vmatmul.mubr.msk.f32.gmra.mxu1 %vm361_vm1, %v350_v52  ;;  %v632_v52 = vld [vmem:[%s1743_s4 + $0x28] sm:$0xff] }
  0xfd   :  { %1231 = vmatprep.mubr.msk.f32.mxu1 %vm361_vm1, %v351_v53  ;;  %v633_v53 = vld [vmem:[%s1743_s4 + $0x30] sm:$0xff] }
 0x100   :  { %1232 = vmatmul.mubr.msk.f32.gmra.mxu1 %vm361_vm1, %v352_v54  ;;  %v634_v54 = vld [vmem:[%s1743_s4 + $0x38] sm:$0xff] }
 0x101   :  { %1234 = vmatprep.mubr.msk.f32.mxu1 %vm361_vm1, %v353_v55  ;;  %v635_v55 = vld [vmem:[%s1743_s4 + $0x40] sm:$0xff] }
 0x104   :  { %1235 = vmatmul.mubr.msk.f32.gmra.mxu1 %vm361_vm1, %v354_v56  ;;  %v636_v56 = vld [vmem:[%s1743_s4 + $0x48] sm:$0xff] }
 0x105   :  { %1237 = vmatprep.mubr.msk.f32.mxu1 %vm361_vm1, %v355_v57  ;;  %v637_v57 = vld [vmem:[%s1743_s4 + $0x50] sm:$0xff] }
 0x108   :  { %1238 = vmatmul.mubr.msk.f32.gmra.mxu1 %vm361_vm1, %v356_v58  ;;  %v638_v58 = vld [vmem:[%s1743_s4 + $0x58] sm:$0xff] }
 0x109   :  { %1240 = vmatprep.mubr.msk.f32.mxu1 %vm361_vm1, %v357_v59  ;;  %v639_v59 = vld [vmem:[%s1743_s4 + $0x60] sm:$0xff] }
 0x10c   :  { %1241 = vmatmul.mubr.msk.f32.gmra.mxu1 %vm361_vm1, %v358_v60  ;;  %v640_v60 = vld [vmem:[%s1743_s4 + $0x68] sm:$0xff] }
 0x10d   :  { %1243 = vmatprep.mubr.msk.f32.mxu1 %vm361_vm1, %v359_v61  ;;  %v641_v61 = vld [vmem:[%s1743_s4 + $0x70] sm:$0xff] }
 0x110   :  { %1244 = vmatmul.mubr.msk.f32.gmra.mxu1 %vm361_vm1, %v360_v62  ;;  %v642_v62 = vld [vmem:[%s1743_s4 + $0x78] sm:$0xff] }
 0x1b4   :  { %v1224_v0 = vpop.f32.mrf.mxu1 }
 0x1b6   :  { %v476_v1 = vpop.f32.mrf.mxu1 }
 0x1b8   :  { %v1227_v2 = vpop.f32.mrf.mxu1 }
 0x1ba   :  { %v486_v3 = vpop.f32.mrf.mxu1 }
 0x1bc   :  { %v1230_v4 = vpop.f32.mrf.mxu1 }
 0x1be   :  { %v496_v5 = vpop.f32.mrf.mxu1 }
 0x1c0   :  { %v1233_v6 = vpop.f32.mrf.mxu1 }
 0x1c2   :  { %v506_v7 = vpop.f32.mrf.mxu1 }
 0x1c4   :  { %v1236_v8 = vpop.f32.mrf.mxu1 }
 0x1c5   :  { %v556_v34 = vmax.f32 %v1224_v0, %v1236_v8  ;;  %v732_v8 = vpop.permute.xlu0 %731 }
 0x1c6   :  { %v516_v9 = vpop.f32.mrf.mxu1 }
 0x1c7   :  { %v555_v37 = vmax.f32 %v476_v1, %v516_v9  ;;  %v612_v41 = vadd.f32 %v579_v40, %v556_v34 }
 0x1c8   :  { %v1239_v10 = vpop.f32.mrf.mxu1 }
 0x1c9   :  { %v558_v25 = vmax.f32 %v1227_v2, %v1239_v10  ;;  %v611_v44 = vadd.f32 %v574_v43, %v555_v37  ;;  %v620_v46 = vmax.f32 %v612_v41, 0.0 }
 0x1ca   :  { %v526_v12 = vpop.f32.mrf.mxu1 }
 0x1cb   :  { %v557_v30 = vmax.f32 %v486_v3, %v526_v12  ;;  %v614_v35 = vadd.f32 %v589_v29, %v558_v25  ;;  %v619_v47 = vmax.f32 %v611_v44, 0.0 }
 0x1cc   :  { %v1242_v14 = vpop.f32.mrf.mxu1 }
 0x1cd   :  { %v560_v18 = vmax.f32 %v1230_v4, %v1242_v14  ;;  %v613_v38 = vadd.f32 %v584_v33, %v557_v30  ;;  %v622_v42 = vmax.f32 %v614_v35, 0.0 }
 0x1ce   :  { %v536_v15 = vpop.f32.mrf.mxu1 }
 0x1cf   :  { %v559_v22 = vmax.f32 %v496_v5, %v536_v15  ;;  %v616_v26 = vadd.f32 %v599_v16, %v560_v18  ;;  %v621_v45 = vmax.f32 %v613_v38, 0.0 }
 0x1d0   :  { %v1245_v17 = vpop.f32.mrf.mxu1 }
 0x1d1   :  { %v562_v19 = vmax.f32 %v1233_v6, %v1245_v17  ;;  %v615_v31 = vadd.f32 %v594_v20, %v559_v22  ;;  %v624_v36 = vmax.f32 %v616_v26, 0.0  ;;  %v737_v6 = vpop.permute.xlu1 %736 }
 0x1d2   :  { %v546_v21 = vpop.f32.mrf.mxu1 }
 0x1d3   :  { %v618_v23 = vadd.f32 %v609_v11, %v562_v19  ;;  %v561_v24 = vmax.f32 %v506_v7, %v546_v21  ;;  %v623_v39 = vmax.f32 %v615_v31, 0.0 }
 0x1d5   :  { %v626_v27 = vmax.f32 %v618_v23, 0.0  ;;  %v617_v28 = vadd.f32 %v604_v13, %v561_v24  ;;  %v727_v11 = vpop.permute.xlu1 %726  ;;  %v722_v13 = vpop.permute.xlu0 %721 }
 0x1d7   :  { %v625_v32 = vmax.f32 %v617_v28, 0.0  ;;  %1246 = vmatprep.subr.mxu0 %v626_v27 }
 0x1d8   :  { %1247 = vmatpush3.msra.mxu0 %v626_v27 }
 0x1d9   :  { %1248 = vmatprep.subr.mxu0 %v625_v32  ;;  %v717_v16 = vpop.permute.xlu1 %716  ;;  %v712_v18 = vpop.permute.xlu0 %711 }
 0x1da   :  { %1249 = vmatpush3.msra.mxu0 %v625_v32 }
 0x1db   :  { %1250 = vmatprep.subr.mxu0 %v624_v36 }
 0x1dc   :  { %1251 = vmatpush3.msra.mxu0 %v624_v36 }
 0x1dd   :  { %1252 = vmatprep.subr.mxu0 %v623_v39  ;;  %v707_v22 = vpop.permute.xlu1 %706  ;;  %v702_v27 = vpop.permute.xlu0 %701 }
 0x1de   :  { %1253 = vmatpush3.msra.mxu0 %v623_v39 }
 0x1df   :  { %1254 = vmatprep.subr.mxu0 %v622_v42 }
 0x1e0   :  { %1255 = vmatpush3.msra.mxu0 %v622_v42 }
 0x1e1   :  { %1256 = vmatprep.subr.mxu0 %v621_v45  ;;  %v697_v32 = vpop.permute.xlu1 %696  ;;  %v692_v35 = vpop.permute.xlu0 %691 }
 0x1e2   :  { %1257 = vmatpush3.msra.mxu0 %v621_v45 }
 0x1e3   :  { %1258 = vmatprep.subr.mxu0 %v620_v46 }
 0x1e4   :  { %1259 = vmatpush3.msra.mxu0 %v620_v46 }
 0x1e5   :  { %1260 = vmatprep.subr.mxu0 %v619_v47  ;;  %v687_v40 = vpop.permute.xlu1 %686  ;;  %v682_v43 = vpop.permute.xlu0 %681 }
 0x1e6   :  { %1261 = vmatpush3.msra.mxu0 %v619_v47 }
 0x1e7   :  { %1263 = vmatmul.mubr.msk.f32.vlgmr.msra.gmra.mxu0 %vm739_vm2, %v628_v48  ;;  %1286 = vmatprep.subr.mxu0 %v1335_v63 }
 0x1e8   :  { %1265 = vmatprep.mubr.msk.f32.mxu0 %vm739_vm2, %v629_v49 }
 0x1e9   :  { %v677_v48 = vpop.permute.xlu1 %676 }
 0x1eb   :  { %1266 = vmatmul.mubr.msk.f32.gmra.mxu0 %vm739_vm2, %v630_v50 }
 0x1ec   :  { %1268 = vmatprep.mubr.msk.f32.mxu0 %vm739_vm2, %v631_v51  ;;  %v672_v51 = vpop.permute.xlu0 %671 }
 0x1ef   :  { %1269 = vmatmul.mubr.msk.f32.gmra.mxu0 %vm739_vm2, %v632_v52 }
 0x1f0   :  { %1271 = vmatprep.mubr.msk.f32.mxu0 %vm739_vm2, %v633_v53 }
 0x1f3   :  { %1272 = vmatmul.mubr.msk.f32.gmra.mxu0 %vm739_vm2, %v634_v54 }
 0x1f4   :  { %1274 = vmatprep.mubr.msk.f32.mxu0 %vm739_vm2, %v635_v55 }
 0x1f7   :  { %1275 = vmatmul.mubr.msk.f32.gmra.mxu0 %vm739_vm2, %v636_v56  ;;  %v667_v56 = vpop.permute.xlu1 %666 }
 0x1f8   :  { %1277 = vmatprep.mubr.msk.f32.mxu0 %vm739_vm2, %v637_v57 }
 0x1fb   :  { %1278 = vmatmul.mubr.msk.f32.gmra.mxu0 %vm739_vm2, %v638_v58 }
 0x1fc   :  { %1280 = vmatprep.mubr.msk.f32.mxu0 %vm739_vm2, %v639_v59  ;;  %v662_v59 = vpop.permute.xlu0 %661 }
 0x1ff   :  { %1281 = vmatmul.mubr.msk.f32.gmra.mxu0 %vm739_vm2, %v640_v60 }
 0x200   :  { %1283 = vmatprep.mubr.msk.f32.mxu0 %vm739_vm2, %v641_v61 }
 0x203   :  { %1284 = vmatmul.mubr.msk.f32.gmra.mxu0 %vm739_vm2, %v642_v62 }
 0x204   :  { %1318 = vmatprep.mubr.msk.f32.mxu0 %vm1336_vm3, %v1335_v63 }
 0x2a7   :  { %v1703_v0 = vpop.f32.mrf.mxu0 }
 0x2a8   :  { %v860_v57 = vadd.f32 %v1703_v0, %v667_v56  ;;  %v949_v0 = vld [vmem:[%s1744_s6] sm:$0xff] }
 0x2a9   :  { %v1705_v1 = vpop.f32.mrf.mxu0 }
 0x2aa   :  { %v855_v60 = vadd.f32 %v1705_v1, %v662_v59  ;;  %v934_v62 = vmax.f32 %v860_v57, 0.0 }
 0x2ab   :  { %v1707_v2 = vpop.f32.mrf.mxu0 }
 0x2ac   :  { %v870_v52 = vadd.f32 %v1707_v2, %v677_v48  ;;  %v933_v2 = vmax.f32 %v855_v60, 0.0 }
 0x2ad   :  { %v1709_v3 = vpop.f32.mrf.mxu0 }
 0x2ae   :  { %v865_v54 = vadd.f32 %v1709_v3, %v672_v51  ;;  %v936_v58 = vmax.f32 %v870_v52, 0.0  ;;  %v954_v3 = vpop.permute.xlu1 %953 }
 0x2af   :  { %v1270_v4 = vpop.f32.mrf.mxu0 }
 0x2b0   :  { %v880_v46 = vadd.f32 %v1270_v4, %v687_v40  ;;  %v935_v61 = vmax.f32 %v865_v54, 0.0 }
 0x2b1   :  { %v874_v5 = vpop.f32.mrf.mxu0 }
 0x2b2   :  { %v875_v49 = vadd.f32 %v874_v5, %v682_v43  ;;  %v938_v53 = vmax.f32 %v880_v46, 0.0 }
 0x2b3   :  { %v1273_v7 = vpop.f32.mrf.mxu0 }
 0x2b4   :  { %v890_v41 = vadd.f32 %v1273_v7, %v697_v32  ;;  %v937_v55 = vmax.f32 %v875_v49, 0.0 }
 0x2b5   :  { %v884_v9 = vpop.f32.mrf.mxu0 }
 0x2b6   :  { %v885_v44 = vadd.f32 %v884_v9, %v692_v35  ;;  %v940_v47 = vmax.f32 %v890_v41, 0.0 }
 0x2b7   :  { %v1276_v10 = vpop.f32.mrf.mxu0 }
 0x2b8   :  { %v900_v36 = vadd.f32 %v1276_v10, %v707_v22  ;;  %v939_v50 = vmax.f32 %v885_v44, 0.0 }
 0x2b9   :  { %v894_v12 = vpop.f32.mrf.mxu0 }
 0x2ba   :  { %v895_v38 = vadd.f32 %v894_v12, %v702_v27  ;;  %v942_v42 = vmax.f32 %v900_v36, 0.0 }
 0x2bb   :  { %v1279_v14 = vpop.f32.mrf.mxu0 }
 0x2bc   :  { %v910_v30 = vadd.f32 %v1279_v14, %v717_v16  ;;  %v941_v45 = vmax.f32 %v895_v38, 0.0 }
 0x2bd   :  { %v904_v15 = vpop.f32.mrf.mxu0 }
 0x2be   :  { %v905_v33 = vadd.f32 %v904_v15, %v712_v18  ;;  %v944_v37 = vmax.f32 %v910_v30, 0.0 }
 0x2bf   :  { %v1282_v17 = vpop.f32.mrf.mxu0 }
 0x2c0   :  { %v920_v24 = vadd.f32 %v1282_v17, %v727_v11  ;;  %v943_v39 = vmax.f32 %v905_v33, 0.0 }
 0x2c1   :  { %v914_v19 = vpop.f32.mrf.mxu0 }
 0x2c2   :  { %v915_v28 = vadd.f32 %v914_v19, %v722_v13  ;;  %v946_v31 = vmax.f32 %v920_v24, 0.0 }
 0x2c3   :  { %v1285_v20 = vpop.f32.mrf.mxu0 }
 0x2c4   :  { %v930_v21 = vadd.f32 %v1285_v20, %v737_v6  ;;  %v945_v34 = vmax.f32 %v915_v28, 0.0 }
 0x2c5   :  { %v924_v23 = vpop.f32.mrf.mxu0 }
 0x2c6   :  { %v948_v25 = vmax.f32 %v930_v21, 0.0  ;;  %v925_v26 = vadd.f32 %v924_v23, %v732_v8 }
 0x2c8   :  { %v947_v29 = vmax.f32 %v925_v26, 0.0  ;;  %1287 = vmatpush3.msra.mxu0 %v948_v25 }
 0x2c9   :  { %1288 = vmatprep.subr.mxu0 %v1335_v63 }
 0x2ca   :  { %1289 = vmatpush3.msra.mxu0 %v947_v29 }
 0x2cb   :  { %1290 = vmatprep.subr.mxu0 %v1335_v63 }
 0x2cc   :  { %1291 = vmatpush3.msra.mxu0 %v946_v31 }
 0x2cd   :  { %1292 = vmatprep.subr.mxu0 %v1335_v63 }
 0x2ce   :  { %1293 = vmatpush3.msra.mxu0 %v945_v34 }
 0x2cf   :  { %1294 = vmatprep.subr.mxu0 %v1335_v63 }
 0x2d0   :  { %1295 = vmatpush3.msra.mxu0 %v944_v37 }
 0x2d1   :  { %1296 = vmatprep.subr.mxu0 %v1335_v63 }
 0x2d2   :  { %1297 = vmatpush3.msra.mxu0 %v943_v39 }
 0x2d3   :  { %1298 = vmatprep.subr.mxu0 %v1335_v63 }
 0x2d4   :  { %1299 = vmatpush3.msra.mxu0 %v942_v42 }
 0x2d5   :  { %1300 = vmatprep.subr.mxu0 %v1335_v63 }
 0x2d6   :  { %1301 = vmatpush3.msra.mxu0 %v941_v45 }
 0x2d7   :  { %1302 = vmatprep.subr.mxu0 %v1335_v63 }
 0x2d8   :  { %1303 = vmatpush3.msra.mxu0 %v940_v47 }
 0x2d9   :  { %1304 = vmatprep.subr.mxu0 %v1335_v63 }
 0x2da   :  { %1305 = vmatpush3.msra.mxu0 %v939_v50 }
 0x2db   :  { %1306 = vmatprep.subr.mxu0 %v1335_v63 }
 0x2dc   :  { %1307 = vmatpush3.msra.mxu0 %v938_v53 }
 0x2dd   :  { %1308 = vmatprep.subr.mxu0 %v1335_v63 }
 0x2de   :  { %1309 = vmatpush3.msra.mxu0 %v937_v55 }
 0x2df   :  { %1310 = vmatprep.subr.mxu0 %v1335_v63 }
 0x2e0   :  { %1311 = vmatpush3.msra.mxu0 %v936_v58 }
 0x2e1   :  { %1312 = vmatprep.subr.mxu0 %v1335_v63 }
 0x2e2   :  { %1313 = vmatpush3.msra.mxu0 %v935_v61 }
 0x2e3   :  { %1314 = vmatprep.subr.mxu0 %v1335_v63 }
 0x2e4   :  { %1315 = vmatpush3.msra.mxu0 %v934_v62 }
 0x2e5   :  { %1316 = vmatprep.subr.mxu0 %v1335_v63 }
 0x2e6   :  { %1317 = vmatpush3.msra.mxu0 %v933_v2 }
 0x2e7   :  { %1319 = vmatmul.mubr.f32.vlgmr.msra.gmra.mxu0 %v949_v0 }
 0x3a7   :  { %v1022_v1 = vpop.f32.mrf.mxu0 }
 0x3a8   :  { %v1023_v4 = vadd.f32 %v1022_v1, %v954_v3 }
 0x3a9   :  { %v1320_v5 = vpop.f32.mrf.mxu0 }
 0x3aa   :  { %1026 = vst [vmem:[%s1745_s9] sm:$0xff] %v1023_v4 }

</bundles_post_ra>
